<compile_context>
chip_gen: v7x
topology: tpu7x:2x2x1
jax: 0.10.0
libtpu: 0.0.40
codegen_flags: <defaults>
</compile_context>

<pallas_src>
import functools
import warnings

import jax
import jax.numpy as jnp
from jax.experimental import pallas as pl
from jax.experimental.pallas import tpu as pltpu

warnings.filterwarnings("ignore", message="Some donated buffers were not usable")


def _affine_kernel(x_ref, scale_ref, bias_ref, o_ref):
    """x_ref/o_ref: (TR, TL) slab tile; scale_ref/bias_ref: (TR, 1) row params."""
    o_ref[...] = x_ref[...] * scale_ref[...] + bias_ref[...]


def _pick_tile(dim, base, cap, want_multi=False):
    """Largest multiple of `base` that divides `dim` and is <= cap.

    If `dim` is not a multiple of `base`, return `dim` itself: a block dim equal
    to the full array dim is exempt from the (8,128) rule, so no HBM pad/slice
    round-trip is ever needed.  With want_multi, prefer leaving >= 2 blocks.
    """
    if dim % base != 0:
        return dim
    cap_eff = max(base, min(cap, dim))
    candidates = [t for t in range(base, cap_eff + 1, base) if dim % t == 0]
    if want_multi:
        multi = [t for t in candidates if dim // t >= 2]
        if multi:
            return max(multi)
    return max(candidates)


def _tpu_tile_config():
    """Per-generation tile caps + scoped-VMEM limit (DMA-bound streaming op)."""
    try:
        vmem_cap = int(pltpu.get_tpu_info().vmem_capacity_bytes)
    except Exception:
        vmem_cap = 64 * 1024 * 1024  # unknown: assume the smallest (v7x) budget
    if vmem_cap <= 64 * 1024 * 1024:
        # v7x-class: 64 MiB VMEM/TC -> ~4 MiB tiles, <=40 MiB scoped limit.
        return {"tr_cap": 512, "tl_cap": 2048, "tile_bytes": 4 << 20,
                "vmem_limit": 40 * 1024 * 1024}
    # v5e / v6e (128 MiB VMEM): ~8 MiB tiles; explicit 64 MiB scoped limit.
    return {"tr_cap": 512, "tl_cap": 4096, "tile_bytes": 8 << 20,
            "vmem_limit": 64 * 1024 * 1024}


def _apply_affine(x, scale, bias):
    """f(x): per-channel affine, streamed as a lane-dense 2-D tiled Pallas kernel."""
    N, C, H, W = x.shape
    R, L = N * C, H * W
    itemsize = x.dtype.itemsize
    sub = {4: 8, 2: 16, 1: 32}.get(itemsize, 8)  # dtype-aware sublane granularity

    cfg = _tpu_tile_config()

    # Lane tile: largest 128-multiple divisor of L (unmasked vst, no partial tile).
    TL = _pick_tile(L, 128, cfg["tl_cap"])
    # Row tile: keep the (TR, TL) tile within the per-tile VMEM budget.
    # (If L is both huge and not a 128-multiple, TR falls back to `sub`.)
    row_cap = max(sub, (min(cfg["tr_cap"],
                            cfg["tile_bytes"] // max(1, TL * itemsize)) // sub) * sub)
    TR = _pick_tile(R, sub, row_cap)

    # Megacore: if a large slab landed in a single tile, re-split one axis so
    # both v7x TensorCores get grid work (one extra cheap step elsewhere).
    if (R // TR) * (L // TL) <= 1 and R * L * itemsize >= (4 << 20):
        TL2 = _pick_tile(L, 128, TL, want_multi=True)
        if L // TL2 >= 2:
            TL = TL2
        else:
            TR = _pick_tile(R, sub, TR, want_multi=True)

    x2 = x.reshape(R, L)  # contiguous reshape: no HBM copy
    # Per-row (= per (n, c)) parameters; tiny (R, 1) arrays.
    scale_rows = jnp.broadcast_to(scale.astype(x.dtype)[None, :], (N, C)).reshape(R, 1)
    bias_rows = jnp.broadcast_to(bias.astype(x.dtype)[None, :], (N, C)).reshape(R, 1)

    out2 = pl.pallas_call(
        _affine_kernel,
        out_shape=jax.ShapeDtypeStruct((R, L), x.dtype),
        grid=(pl.cdiv(R, TR), pl.cdiv(L, TL)),
        in_specs=[
            pl.BlockSpec((TR, TL), lambda i, j: (i, j)),
            pl.BlockSpec((TR, 1), lambda i, j: (i, 0)),  # block idx constant over j
            pl.BlockSpec((TR, 1), lambda i, j: (i, 0)),  # -> not re-DMA'd per lane tile
        ],
        out_specs=pl.BlockSpec((TR, TL), lambda i, j: (i, j)),
        # In-place: each output block is written back into x2's buffer
        # (read-before-write per block under the pipeline) -> halves HBM footprint.
        input_output_aliases={0: 0},
        compiler_params=pltpu.CompilerParams(
            dimension_semantics=("parallel", "parallel"),
            vmem_limit_bytes=cfg["vmem_limit"],
        ),
    )(x2, scale_rows, bias_rows)

    return out2.reshape(N, C, H, W)


@functools.partial(jax.jit, donate_argnums=(0,))
def prob_transform(x, scale, bias, key, p):
    """JAX/Pallas equivalent of ProbTransform(f, p)(x) with f = channel affine.

    x:     (N, C, H, W) float32 (NCHW, as in PyTorch); donated.
    scale: (C,) float32
    bias:  (C,) float32
    key:   PRNG key for the single Bernoulli(p) draw (== random.random() < p)
    p:     traced scalar probability (no recompile per p value)
    """
    u = jax.random.uniform(key, (), dtype=jnp.float32)
    apply = u < jnp.asarray(p, dtype=jnp.float32)
    # Identity branch skips the kernel entirely; with donation it is a no-op.
    return jax.lax.cond(
        apply,
        lambda xx: _apply_affine(xx, scale, bias),
        lambda xx: xx,
        x,
    )


if __name__ == "__main__":
    key = jax.random.PRNGKey(0)
    k_x, k_p = jax.random.split(key)

    N, C, H, W = 2, 4, 16, 16

    # Deterministic parameter init for the surrogate `f` (per-channel affine).
    scale = 1.0 + 0.1 * jnp.arange(C, dtype=jnp.float32)   # [1.0, 1.1, 1.2, 1.3]
    bias = 0.05 * jnp.arange(C, dtype=jnp.float32) - 0.1   # [-0.1, -0.05, 0.0, 0.05]

    def make_x():
        return jax.random.normal(k_x, (N, C, H, W), dtype=jnp.float32)

    # p = 1.0 -> transform always applied (matches ProbTransform default p=1).
    x = make_x()
    ref = jax.block_until_ready(
        x * scale.reshape(1, C, 1, 1) + bias.reshape(1, C, 1, 1))
    out = jax.block_until_ready(prob_transform(x, scale, bias, k_p, 1.0))  # donates x
    assert out.shape == (N, C, H, W) and out.dtype == jnp.float32
    assert jnp.allclose(out, ref, atol=1e-6, rtol=1e-6)

    # p = 0.0 -> identity path (kernel skipped via lax.cond, input donated).
    x_vals = make_x()  # reference copy with identical values (same key)
    out_id = jax.block_until_ready(prob_transform(make_x(), scale, bias, k_p, 0.0))
    assert jnp.allclose(out_id, x_vals, atol=0.0, rtol=0.0)

    print("KERNEL_OK")
</pallas_src>

<mosaic_0001>
module attributes {stable_mosaic.version = 11 : i64} {
  func.func @_affine_kernel(%arg0: i32, %arg1: i32, %arg2: memref<8x256xf32, #tpu.memory_space<vmem>>, %arg3: memref<8x1xf32, #tpu.memory_space<vmem>>, %arg4: memref<8x1xf32, #tpu.memory_space<vmem>>, %arg5: memref<8x256xf32, #tpu.memory_space<vmem>>) attributes {dimension_semantics = [#tpu.dimension_semantics<parallel>, #tpu.dimension_semantics<parallel>], iteration_bounds = array<i64: 1, 1>, scalar_prefetch = 0 : i64, scratch_operands = 0 : i64, tpu.core_type = #tpu.core_type<tc>, window_params = [{transform_indices = @transform_0, window_bounds = array<i64: 8, 256>}, {transform_indices = @transform_1, window_bounds = array<i64: 8, 1>}, {transform_indices = @transform_2, window_bounds = array<i64: 8, 1>}, {transform_indices = @transform_3, window_bounds = array<i64: 8, 256>}]} {
    %c0 = arith.constant 0 : index
    %c0_0 = arith.constant 0 : index
    %0 = vector.load %arg2[%c0, %c0_0] : memref<8x256xf32, #tpu.memory_space<vmem>>, vector<8x256xf32>
    %c0_1 = arith.constant 0 : index
    %c0_2 = arith.constant 0 : index
    %1 = vector.load %arg3[%c0_1, %c0_2] : memref<8x1xf32, #tpu.memory_space<vmem>>, vector<8x1xf32>
    %2 = vector.broadcast %1 : vector<8x1xf32> to vector<8x256xf32>
    %3 = arith.mulf %0, %2 : vector<8x256xf32>
    %c0_3 = arith.constant 0 : index
    %c0_4 = arith.constant 0 : index
    %4 = vector.load %arg4[%c0_3, %c0_4] : memref<8x1xf32, #tpu.memory_space<vmem>>, vector<8x1xf32>
    %5 = vector.broadcast %4 : vector<8x1xf32> to vector<8x256xf32>
    %6 = arith.addf %3, %5 : vector<8x256xf32>
    %c0_5 = arith.constant 0 : index
    %c0_6 = arith.constant 0 : index
    %7 = vector.load %arg5[%c0_5, %c0_6] : memref<8x256xf32, #tpu.memory_space<vmem>>, vector<8x256xf32>
    tpu.vector_store %arg5[%c0_5, %c0_6], %6 {strides = array<i32>} : memref<8x256xf32, #tpu.memory_space<vmem>>, vector<8x256xf32>,
    return
  }
  func.func @transform_0(%arg0: i32, %arg1: i32) -> (i32, i32) {
    %c0_i32 = arith.constant 0 : i32
    return %arg0, %arg1 : i32, i32
  }
  func.func @transform_1(%arg0: i32, %arg1: i32) -> (i32, i32) {
    %c0_i32 = arith.constant 0 : i32
    %c0_i32_0 = arith.constant 0 : i32
    return %arg0, %c0_i32 : i32, i32
  }
  func.func @transform_2(%arg0: i32, %arg1: i32) -> (i32, i32) {
    %c0_i32 = arith.constant 0 : i32
    %c0_i32_0 = arith.constant 0 : i32
    return %arg0, %c0_i32 : i32, i32
  }
  func.func @transform_3(%arg0: i32, %arg1: i32) -> (i32, i32) {
    %c0_i32 = arith.constant 0 : i32
    return %arg0, %arg1 : i32, i32
  }
}

</mosaic_0001>

<bundles_post_ra>
// kernel: branch_1_fun.1
= control target key start
LH: loop header
LB: loop body
LE: loop exit
PB: predicated region body
PF: predicated region fallthrough
CT: control target
= control target key end

     0   :  { %v40_v0 = vmov 0   ;;  %s79_s1 = inlined_call_operand.vmem [shape: f32[8,1], index: 1, kind: input, shape index: {}]   ;;  %s80_s2 = inlined_call_operand.vmem [shape: f32[8,1], index: 2, kind: input, shape index: {}]   ;;  %s81_s0 = inlined_call_operand.vmem [shape: f32[8,256], index: 0, kind: input, shape index: {}, may-alias: {0,3}]   ;;  %s82_s3 = inlined_call_operand.vmem [shape: f32[8,256], index: 3, kind: output, shape index: {}, may-alias: {0,3}]  }
   0x1   :  { %39 = vset.pattern.permute.xlu0 %v40_v0  ;;  %v16_v1 = vld [vmem:[%s79_s1] sm:$0xff]  ;;  %v15_v5 = vld [vmem:[%s81_s0 + $0x8] sm:$0xff] }
   0x2   :  { %19 = vperm.xlu0 %39, %v16_v1   ;;  %v24_v2 = vld [vmem:[%s80_s2] sm:$0xff] }
   0x3   :  { %v14_v4 = vld [vmem:[%s81_s0] sm:$0xff] }
   0x6   :  { %27 = vperm.xlu0 %39, %v24_v2  }
  0x81   :  { %v20_v3 = vpop.permute.xlu0 %19 }
  0x82   :  { %v22_v6 = vmul.f32 %v20_v3, %v14_v4  ;;  %v23_v7 = vmul.f32 %v20_v3, %v15_v5 }
  0x85   :  { %v28_v8 = vpop.permute.xlu0 %27 }
  0x86   :  { %v30_v9 = vadd.f32 %v28_v8, %v22_v6  ;;  %v31_v10 = vadd.f32 %v28_v8, %v23_v7 }
  0x88   :  { %32 = vst [vmem:[%s82_s3] sm:$0xff] %v30_v9  ;;  %33 = vst [vmem:[%s82_s3 + $0x8] sm:$0xff] %v31_v10 }

</bundles_post_ra>
